<compile_context>
chip_gen: v7x
topology: tpu7x:2x2x1
jax: 0.10.0
libtpu: 0.0.40
codegen_flags: <defaults>
</compile_context>

<pallas_src>
import jax
import jax.numpy as jnp
from jax.experimental import pallas as pl
from jax.experimental.pallas import tpu as pltpu

_HIGHEST = jax.lax.Precision.HIGHEST


def cross_attn_kernel(q_ref, k_ref, v_ref, o_ref):
    # Refs hold either the full problem (B, S, D) or a single batch (1, S, D)
    # depending on the grid chosen in the wrapper; the body is identical.
    q = q_ref[...]
    k = k_ref[...]
    v = v_ref[...]

    # scores = Q @ K^T -> (b, Sq, Sk); contract last dims directly (no .T),
    # f32 accumulation, exact f32 matmul precision.
    s = jnp.einsum("bqd,bkd->bqk", q, k,
                   preferred_element_type=jnp.float32, precision=_HIGHEST)

    # Numerically-stable softmax along last dim (matches torch.softmax(dim=-1)).
    # Exact divide (no approx reciprocal) — see correctness note in header.
    m = jnp.max(s, axis=-1, keepdims=True)
    p = jnp.exp(s - m)
    p = p / jnp.sum(p, axis=-1, keepdims=True)

    # output = attn @ V -> (b, Sq, D)
    out = jnp.einsum("bqk,bkd->bqd", p, v.astype(jnp.float32),
                     preferred_element_type=jnp.float32, precision=_HIGHEST)
    o_ref[...] = out.astype(o_ref.dtype)


def _has_two_tensorcores():
    """True on chips with 2 TensorCores (v7x); conservative False otherwise."""
    try:
        kind = jax.devices()[0].device_kind.lower()
        return ("v7" in kind) or ("7x" in kind)
    except Exception:  # pragma: no cover - defensive; fall back to single TC
        return False


def cross_attention(Q, K, V):
    """softmax(Q @ K^T, axis=-1) @ V, batched over the leading axis."""
    B, Sq, D = Q.shape
    _, Sk, _ = K.shape
    assert K.shape == (B, Sk, D) and V.shape == (B, Sk, D)

    if _has_two_tensorcores() and B > 1:
        # v7x: one batch element per grid step, "parallel" so the two
        # TensorCores each take a step — no sequential pipeline overhead.
        grid = (B,)
        q_spec = pl.BlockSpec((1, Sq, D), lambda b: (b, 0, 0))
        kv_spec = pl.BlockSpec((1, Sk, D), lambda b: (b, 0, 0))
        o_spec = pl.BlockSpec((1, Sq, D), lambda b: (b, 0, 0))
        dims = ("parallel",)
    else:
        # v5e / v6e (single TC): one grid step over the whole (tiny) problem —
        # one DMA per operand, zero per-step overhead.
        grid = (1,)
        q_spec = pl.BlockSpec((B, Sq, D), lambda i: (0, 0, 0))
        kv_spec = pl.BlockSpec((B, Sk, D), lambda i: (0, 0, 0))
        o_spec = pl.BlockSpec((B, Sq, D), lambda i: (0, 0, 0))
        dims = ("arbitrary",)

    return pl.pallas_call(
        cross_attn_kernel,
        out_shape=jax.ShapeDtypeStruct((B, Sq, D), Q.dtype),
        grid_spec=pltpu.PrefetchScalarGridSpec(
            num_scalar_prefetch=0,
            grid=grid,
            in_specs=[q_spec, kv_spec, kv_spec],
            out_specs=o_spec,
        ),
        compiler_params=pltpu.CompilerParams(dimension_semantics=dims),
    )(Q, K, V)


def init_cross_attention_params(latent_dim, key):
    """Deterministic init of the (unused-in-forward) Linear params,
    mirroring nn.Linear(latent_dim, latent_dim) x3 from __init__."""
    params = {}
    bound = 1.0 / jnp.sqrt(latent_dim)
    for name in ("query", "key", "value"):
        key, kw, kb = jax.random.split(key, 3)
        params[name] = {
            "weight": jax.random.uniform(
                kw, (latent_dim, latent_dim), jnp.float32, -bound, bound),
            "bias": jax.random.uniform(
                kb, (latent_dim,), jnp.float32, -bound, bound),
        }
    return params


if __name__ == "__main__":
    B, Sq, Sk, D = 2, 8, 8, 32  # latent_dim = 32

    root = jax.random.PRNGKey(0)
    kq, kk, kv, kp = jax.random.split(root, 4)

    Q = jax.random.normal(kq, (B, Sq, D), jnp.float32)
    K = jax.random.normal(kk, (B, Sk, D), jnp.float32)
    V = jax.random.normal(kv, (B, Sk, D), jnp.float32)

    # Parameters exist per __init__ but are not used by forward (matches PyTorch).
    _params = init_cross_attention_params(D, kp)

    out = jax.block_until_ready(cross_attention(Q, K, V))

    # Pure-JAX reference of the forward semantics (exact f32 matmuls so the
    # comparison is apples-to-apples with the kernel's HIGHEST-precision dots).
    scores = jnp.einsum("bqd,bkd->bqk", Q, K, precision=_HIGHEST)
    attn = jax.nn.softmax(scores, axis=-1)
    ref = jnp.einsum("bqk,bkd->bqd", attn, V, precision=_HIGHEST)

    assert out.shape == (B, Sq, D)
    max_err = float(jnp.max(jnp.abs(out - ref)))
    assert jnp.allclose(out, ref, atol=1e-4, rtol=1e-4), max_err

    print("KERNEL_OK")
</pallas_src>

<mosaic_0001>
module attributes {stable_mosaic.version = 11 : i64} {
  func.func @cross_attn_kernel(%arg0: i32, %arg1: memref<2x8x32xf32, #tpu.memory_space<vmem>>, %arg2: memref<2x8x32xf32, #tpu.memory_space<vmem>>, %arg3: memref<2x8x32xf32, #tpu.memory_space<vmem>>, %arg4: memref<2x8x32xf32, #tpu.memory_space<vmem>>) attributes {dimension_semantics = [#tpu.dimension_semantics<arbitrary>], iteration_bounds = array<i64: 1>, scalar_prefetch = 0 : i64, scratch_operands = 0 : i64, tpu.core_type = #tpu.core_type<tc>, window_params = [{pipeline_mode = #tpu.pipeline_mode<synchronous>, transform_indices = @transform_0, window_bounds = array<i64: 2, 8, 32>}, {pipeline_mode = #tpu.pipeline_mode<synchronous>, transform_indices = @transform_1, window_bounds = array<i64: 2, 8, 32>}, {pipeline_mode = #tpu.pipeline_mode<synchronous>, transform_indices = @transform_2, window_bounds = array<i64: 2, 8, 32>}, {pipeline_mode = #tpu.pipeline_mode<synchronous>, transform_indices = @transform_3, window_bounds = array<i64: 2, 8, 32>}]} {
    %c0 = arith.constant 0 : index
    %c0_0 = arith.constant 0 : index
    %c0_1 = arith.constant 0 : index
    %0 = vector.load %arg1[%c0, %c0_0, %c0_1] : memref<2x8x32xf32, #tpu.memory_space<vmem>>, vector<2x8x32xf32>
    %c0_2 = arith.constant 0 : index
    %c0_3 = arith.constant 0 : index
    %c0_4 = arith.constant 0 : index
    %1 = vector.load %arg2[%c0_2, %c0_3, %c0_4] : memref<2x8x32xf32, #tpu.memory_space<vmem>>, vector<2x8x32xf32>
    %c0_5 = arith.constant 0 : index
    %c0_6 = arith.constant 0 : index
    %c0_7 = arith.constant 0 : index
    %2 = vector.load %arg3[%c0_5, %c0_6, %c0_7] : memref<2x8x32xf32, #tpu.memory_space<vmem>>, vector<2x8x32xf32>
    "tpu.trace_start"() <{level = 10 : i32, message = "bqd,bkd->bqk"}> : () -> ()
    %cst = arith.constant dense<0.000000e+00> : vector<2x8x8xf32>
    %3 = tpu.matmul %0, %1, %cst {dimension_numbers = #tpu.dot_dimension_numbers<[2], [2], [1], [1], [0, 0, 0, 1, 1, 1], [0], [0]>, precision = #tpu.contract_precision<fp32>} : vector<2x8x32xf32>, vector<2x8x32xf32>, vector<2x8x8xf32> -> vector<2x8x8xf32>
    "tpu.trace_stop"() : () -> ()
    %cst_8 = arith.constant dense<0xFF800000> : vector<2x8xf32>
    %4 = vector.multi_reduction <maximumf>, %3, %cst_8 [2] : vector<2x8x8xf32> to vector<2x8xf32>
    %5 = vector.shape_cast %4 : vector<2x8xf32> to vector<2x8x1xf32>
    %6 = vector.broadcast %5 : vector<2x8x1xf32> to vector<2x8x8xf32>
    %7 = arith.subf %3, %6 : vector<2x8x8xf32>
    %8 = math.exp %7 : vector<2x8x8xf32>
    %cst_9 = arith.constant dense<0.000000e+00> : vector<2x8xf32>
    %9 = vector.multi_reduction <add>, %8, %cst_9 [2] : vector<2x8x8xf32> to vector<2x8xf32>
    %10 = vector.shape_cast %9 : vector<2x8xf32> to vector<2x8x1xf32>
    %11 = vector.broadcast %10 : vector<2x8x1xf32> to vector<2x8x8xf32>
    %12 = arith.divf %8, %11 : vector<2x8x8xf32>
    "tpu.trace_start"() <{level = 10 : i32, message = "bqk,bkd->bqd"}> : () -> ()
    %cst_10 = arith.constant dense<0.000000e+00> : vector<2x8x32xf32>
    %13 = tpu.matmul %12, %2, %cst_10 {dimension_numbers = #tpu.dot_dimension_numbers<[2], [1], [1], [2], [0, 0, 0, 1, 1, 2], [0], [0]>, precision = #tpu.contract_precision<fp32>} : vector<2x8x8xf32>, vector<2x8x32xf32>, vector<2x8x32xf32> -> vector<2x8x32xf32>
    "tpu.trace_stop"() : () -> ()
    %c0_11 = arith.constant 0 : index
    %c0_12 = arith.constant 0 : index
    %c0_13 = arith.constant 0 : index
    %14 = vector.load %arg4[%c0_11, %c0_12, %c0_13] : memref<2x8x32xf32, #tpu.memory_space<vmem>>, vector<2x8x32xf32>
    tpu.vector_store %arg4[%c0_11, %c0_12, %c0_13], %13 {strides = array<i32>} : memref<2x8x32xf32, #tpu.memory_space<vmem>>, vector<2x8x32xf32>,
    return
  }
  func.func @transform_0(%arg0: i32) -> (i32, i32, i32) {
    %c0_i32 = arith.constant 0 : i32
    %c0_i32_0 = arith.constant 0 : i32
    %c0_i32_1 = arith.constant 0 : i32
    %c0_i32_2 = arith.constant 0 : i32
    return %c0_i32, %c0_i32_0, %c0_i32_1 : i32, i32, i32
  }
  func.func @transform_1(%arg0: i32) -> (i32, i32, i32) {
    %c0_i32 = arith.constant 0 : i32
    %c0_i32_0 = arith.constant 0 : i32
    %c0_i32_1 = arith.constant 0 : i32
    %c0_i32_2 = arith.constant 0 : i32
    return %c0_i32, %c0_i32_0, %c0_i32_1 : i32, i32, i32
  }
  func.func @transform_2(%arg0: i32) -> (i32, i32, i32) {
    %c0_i32 = arith.constant 0 : i32
    %c0_i32_0 = arith.constant 0 : i32
    %c0_i32_1 = arith.constant 0 : i32
    %c0_i32_2 = arith.constant 0 : i32
    return %c0_i32, %c0_i32_0, %c0_i32_1 : i32, i32, i32
  }
  func.func @transform_3(%arg0: i32) -> (i32, i32, i32) {
    %c0_i32 = arith.constant 0 : i32
    %c0_i32_0 = arith.constant 0 : i32
    %c0_i32_1 = arith.constant 0 : i32
    %c0_i32_2 = arith.constant 0 : i32
    return %c0_i32, %c0_i32_0, %c0_i32_1 : i32, i32, i32
  }
}

</mosaic_0001>

<bundles_post_ra>
// kernel: tpu_custom_call.1
= control target key start
LH: loop header
LB: loop body
LE: loop exit
PB: predicated region body
PF: predicated region fallthrough
CT: control target
= control target key end

     0   :  { %8 = vsyncpa [#allocation3], 0  ;;  %s2417_s0 = inlined_call_operand.hbm [shape: f32[2,8,32], index: 0, kind: input, shape index: {}]   ;;  %s2418_s1 = inlined_call_operand.hbm [shape: f32[2,8,32], index: 1, kind: input, shape index: {}]   ;;  %s2419_s2 = inlined_call_operand.hbm [shape: f32[2,8,32], index: 2, kind: input, shape index: {}]   ;;  %s2420_s3 = inlined_call_operand.hbm [shape: f32[2,8,32], index: 3, kind: output, shape index: {}]  }
   0x1   :  { %9 = vsyncpa [#allocation6], 0 }
   0x2   :  { %10 = vsyncpa [#allocation4], 0  ;;  %s2226_s12 = smov [#allocation5]   ;;  %s2227_s14 = smov [#allocation2]  }
   0x3   :  { %s28_s13 = sshll.u32 %s2226_s12, 4  ;;  %s16_s15 = sshll.u32 %s2227_s14, 4  ;;  %s29_s13 = int_to_ptr.vmem [resolvable:$true] %s28_s13  ;;  %s2254_s15 = int_to_ptr.vmem [resolvable:$true] %s16_s15 }
   0x4   :  { %s2132_s18 = scalar_lea.hbm %s2418_s1, 256 }
   0x5   :  { %p2133_p0 = scmp.ne.s32.totalorder %s2418_s1, %s2132_s18  ;;  %p2136_p1 = scmp.lt.u32.totalorder %s2132_s18, %s2418_s1 }
   0x7   :  { %p2138_p2 = pnand %p2136_p1, %p2133_p0 }
   0x9   :  { %2141 = shalt.err (!%p2138_p2)
}
   0xa   :  { %s2142_s23 = scalar_lea.vmem %s29_s13, 256  ;;  %p2147_p4 = scmp.lt.s32.totalorder %s29_s13, %s29_s13 }
   0xb   :  { %p2143_p3 = scmp.ne.s32.totalorder %s29_s13, %s2142_s23  ;;  %p2148_p5 = scmp.lt.s32.totalorder %s2142_s23, %s2142_s23 }
   0xd   :  { %p2149_p6 = por %p2148_p5, %p2147_p4 }
   0xf   :  { %p2150_p7 = pnand %p2149_p6, %p2143_p3 }
  0x11   :  { %2153 = shalt.err (!%p2150_p7)
}
  0x12   :  { %s2228_s24 = smov 128   ;;  %s2229_s25 = smov 8  }
  0x13   :  { %34 = dma.hbm_to_vmem [thread:$0]  %s2418_s1, 256, %s29_s13, [#allocation6], %s2228_s24, %s2228_s24, %s2229_s25  }
  0x14   :  { %s2154_s30 = scalar_lea.hbm %s2417_s0, 256 }
  0x15   :  { %p2155_p8 = scmp.ne.s32.totalorder %s2417_s0, %s2154_s30  ;;  %p2158_p9 = scmp.lt.u32.totalorder %s2154_s30, %s2417_s0 }
  0x17   :  { %p2160_p10 = pnand %p2158_p9, %p2155_p8 }
  0x19   :  { %2163 = shalt.err (!%p2160_p10)
}
  0x1a   :  { %s2164_s8 = scalar_lea.vmem %s2254_s15, 256  ;;  %p2169_p12 = scmp.lt.s32.totalorder %s2254_s15, %s2254_s15 }
  0x1b   :  { %p2165_p11 = scmp.ne.s32.totalorder %s2254_s15, %s2164_s8  ;;  %p2170_p13 = scmp.lt.s32.totalorder %s2164_s8, %s2164_s8 }
  0x1d   :  { %p2171_p0 = por %p2170_p13, %p2169_p12 }
  0x1f   :  { %p2172_p1 = pnand %p2171_p0, %p2165_p11 }
  0x21   :  { %2175 = shalt.err (!%p2172_p1)
}
  0x22   :  { %22 = dma.hbm_to_vmem [thread:$0]  %s2417_s0, 256, %s2254_s15, [#allocation3], %s2228_s24, %s2228_s24, %s2229_s25  }
  0x23   :  { %s2230_s10 = smov [#allocation7]   ;;  %s2176_s14 = scalar_lea.hbm %s2419_s2, 256 }
  0x24   :  { %s40_s11 = sshll.u32 %s2230_s10, 4  ;;  %p2177_p2 = scmp.ne.s32.totalorder %s2419_s2, %s2176_s14  ;;  %s41_s11 = int_to_ptr.vmem [resolvable:$true] %s40_s11 }
  0x25   :  { %p2180_p3 = scmp.lt.u32.totalorder %s2176_s14, %s2419_s2 }
  0x27   :  { %p2182_p4 = pnand %p2180_p3, %p2177_p2 }
  0x29   :  { %2185 = shalt.err (!%p2182_p4)
}
  0x2a   :  { %s2186_s20 = scalar_lea.vmem %s41_s11, 256  ;;  %p2191_p6 = scmp.lt.s32.totalorder %s41_s11, %s41_s11 }
  0x2b   :  { %p2187_p5 = scmp.ne.s32.totalorder %s41_s11, %s2186_s20  ;;  %p2192_p7 = scmp.lt.s32.totalorder %s2186_s20, %s2186_s20 }
  0x2d   :  { %p2193_p8 = por %p2192_p7, %p2191_p6 }
  0x2f   :  { %p2194_p9 = pnand %p2193_p8, %p2187_p5 }
  0x31   :  { %2197 = shalt.err (!%p2194_p9)
}
  0x32   :  { %46 = dma.hbm_to_vmem [thread:$0]  %s2419_s2, 256, %s41_s11, [#allocation6], %s2228_s24, %s2228_s24, %s2229_s25  }
  0x33   :  { %2220 = dma.done.wait [#allocation3], 256  }
  0x34   :  { %2221 = vsyncadd [#allocation3], 4294967040 }
  0x35   :  { %2222 = dma.done.wait [#allocation6], 512  }
  0x36   :  { %2223 = vsyncadd [#allocation6], 4294966784  ;;  %v2231_v0 = vmov 0.0   ;;  %vm2232_vm0 = vmmov 0   ;;  %vm62_vm1 = vcmask 261120   ;;  %v58_v1 = vld [vmem:[#allocation5] sm:$0xff] }
  0x37   :  { %1956 = vmatprep.subr.mxu0 %v2231_v0  ;;  %1986 = vmatprep.subr.mxu1 %v2231_v0  ;;  %v59_v2 = vld [vmem:[#allocation5 + $0x8] sm:$0xff]  ;;  %v56_v3 = vld [vmem:[#allocation2] sm:$0xff]  ;;  %v67_v4 = vsel %vm62_vm1, %v58_v1, 0  ;;  %v57_v7 = vld [vmem:[#allocation2 + $0x8] sm:$0xff]  ;;  %vm967_vm2 = vcmask 64512   ;;  %s2233_s2 = smov [#allocation8]  }
  0x38   :  { %1958 = vmatprep.mubr.msk.f32.mxu0 %vm2232_vm0, %v2231_v0  ;;  %1988 = vmatprep.mubr.msk.f32.mxu1 %vm2232_vm0, %v2231_v0  ;;  %v519_v5 = vsel %vm62_vm1, %v59_v2, 0  ;;  %v64_v6 = vsel %vm62_vm1, %v56_v3, 0  ;;  %v70_v8 = vand.u32 4294901760, %v67_v4  ;;  %v516_v11 = vsel %vm62_vm1, %v57_v7, 0  ;;  %v60_v45 = vld [vmem:[#allocation7] sm:$0xff]  ;;  %v61_v47 = vld [vmem:[#allocation7 + $0x8] sm:$0xff] }
  0x39   :  { %v522_v9 = vand.u32 4294901760, %v519_v5  ;;  %v135_v10 = vand.u32 4294901760, %v64_v6  ;;  %v587_v12 = vand.u32 4294901760, %v516_v11  ;;  %v2356_v46 = vand.u32 4294901760, %v60_v45  ;;  %s1895_s21 = sshll.u32 %s2233_s2, 4  ;;  %s1896_s21 = int_to_ptr.vmem [resolvable:$true] %s1895_s21 }
  0x3a   :  { %1957 = vmatpush3.xpose.msra.mxu0 %v70_v8  ;;  %v147_v13 = vsub.f32 %v67_v4, %v70_v8  ;;  %v2360_v48 = vand.u32 4294901760, %v61_v47  ;;  %s2198_s22 = scalar_lea.vmem %s1896_s21, 256  ;;  %p2203_p11 = scmp.lt.s32.totalorder %s1896_s21, %s1896_s21 }
  0x3b   :  { %1987 = vmatpush3.xpose.msra.mxu1 %v522_v9  ;;  %v599_v14 = vsub.f32 %v519_v5, %v522_v9  ;;  %v136_v15 = vsub.f32 %v64_v6, %v135_v10  ;;  %1961 = vmatprep.subr.mxu0 %v2231_v0  ;;  %v588_v16 = vsub.f32 %v516_v11, %v587_v12  ;;  %p2199_p10 = scmp.ne.s32.totalorder %s1896_s21, %s2198_s22  ;;  %p2204_p12 = scmp.lt.s32.totalorder %s2198_s22, %s2198_s22 }
  0x3c   :  { %1991 = vmatprep.subr.mxu1 %v2231_v0  ;;  %v148_v18 = vand.u32 4294901760, %v147_v13  ;;  %v1071_v51 = vsub.f32 %v60_v45, %v2356_v46  ;;  %v1520_v55 = vsub.f32 %v61_v47, %v2360_v48 }
  0x3d   :  { %v137_v17 = vand.u32 4294901760, %v136_v15  ;;  %v600_v19 = vand.u32 4294901760, %v599_v14  ;;  %v589_v20 = vand.u32 4294901760, %v588_v16  ;;  %p2205_p13 = por %p2204_p12, %p2203_p11 }
  0x3e   :  { %v149_v22 = vsub.f32 %v147_v13, %v148_v18  ;;  %v1072_v56 = vand.u32 4294901760, %v1071_v51  ;;  %v1521_v63 = vand.u32 4294901760, %v1520_v55 }
  0x3f   :  { %v138_v21 = vsub.f32 %v136_v15, %v137_v17  ;;  %v601_v23 = vsub.f32 %v599_v14, %v600_v19  ;;  %v590_v24 = vsub.f32 %v588_v16, %v589_v20  ;;  %p2206_p0 = pnand %p2205_p13, %p2199_p10 }
  0x40   :  { %v150_v26 = vand.u32 4294901760, %v149_v22  ;;  %v1073_v62 = vsub.f32 %v1071_v51, %v1072_v56  ;;  %v1522_v6 = vsub.f32 %v1520_v55, %v1521_v63 }
  0x41   :  { %v139_v25 = vand.u32 4294901760, %v138_v21  ;;  %v602_v27 = vand.u32 4294901760, %v601_v23  ;;  %v591_v28 = vand.u32 4294901760, %v590_v24 }
  0x42   :  { %v1074_v5 = vand.u32 4294901760, %v1073_v62 }
  0x43   :  { %1959 = vmatmul.mubr.f32.vlgmr.msra.gmra.mrb[0].mxu0 %v139_v25  ;;  %1989 = vmatmul.mubr.f32.vlgmr.msra.gmra.mrb[0].mxu1 %v591_v28 }
  0x44   :  { %1962 = vmatpush3.xpose.msra.mxu0 %v150_v26  ;;  %1992 = vmatpush3.xpose.msra.mxu1 %v602_v27 }
  0x45   :  { %1963 = vmatprep.mubr.msk.f32.mxu0 %vm2232_vm0, %v2231_v0  ;;  %1966 = vmatprep.subr.mxu0 %v2231_v0 }
  0x46   :  { %1993 = vmatprep.mubr.msk.f32.mxu1 %vm2232_vm0, %v2231_v0  ;;  %1996 = vmatprep.subr.mxu1 %v2231_v0 }
  0x4b   :  { %1964 = vmatmul.mubr.f32.vlgmr.msra.gmra.mrb[0].mxu0 %v135_v10  ;;  %1994 = vmatmul.mubr.f32.vlgmr.msra.gmra.mrb[0].mxu1 %v587_v12 }
  0x4c   :  { %1967 = vmatpush3.xpose.msra.mxu0 %v147_v13  ;;  %1997 = vmatpush3.xpose.msra.mxu1 %v599_v14 }
  0x4d   :  { %1968 = vmatprep.mubr.msk.f32.mxu0 %vm2232_vm0, %v2231_v0  ;;  %1971 = vmatprep.subr.mxu0 %v2231_v0 }
  0x4e   :  { %1998 = vmatprep.mubr.msk.f32.mxu1 %vm2232_vm0, %v2231_v0  ;;  %2001 = vmatprep.subr.mxu1 %v2231_v0 }
  0x53   :  { %1969 = vmatmul.mubr.f32.vlgmr.msra.gmra.mrb[0].mxu0 %v136_v15  ;;  %1999 = vmatmul.mubr.f32.vlgmr.msra.gmra.mrb[0].mxu1 %v588_v16 }
  0x54   :  { %1972 = vmatpush3.xpose.msra.mxu0 %v70_v8  ;;  %2002 = vmatpush3.xpose.msra.mxu1 %v522_v9 }
  0x55   :  { %1973 = vmatprep.mubr.msk.f32.mxu0 %vm2232_vm0, %v2231_v0  ;;  %1976 = vmatprep.subr.mxu0 %v2231_v0 }
  0x56   :  { %2003 = vmatprep.mubr.msk.f32.mxu1 %vm2232_vm0, %v2231_v0  ;;  %2006 = vmatprep.subr.mxu1 %v2231_v0 }
  0x5b   :  { %1974 = vmatmul.mubr.f32.vlgmr.msra.gmra.mrb[0].mxu0 %v137_v17  ;;  %2004 = vmatmul.mubr.f32.vlgmr.msra.gmra.mrb[0].mxu1 %v589_v20 }
  0x5c   :  { %1977 = vmatpush3.xpose.msra.mxu0 %v148_v18  ;;  %2007 = vmatpush3.xpose.msra.mxu1 %v600_v19 }
  0x5d   :  { %1978 = vmatprep.mubr.msk.f32.mxu0 %vm2232_vm0, %v2231_v0  ;;  %1981 = vmatprep.subr.mxu0 %v2231_v0 }
  0x5e   :  { %2008 = vmatprep.mubr.msk.f32.mxu1 %vm2232_vm0, %v2231_v0  ;;  %2011 = vmatprep.subr.mxu1 %v2231_v0 }
  0x63   :  { %1979 = vmatmul.mubr.f32.vlgmr.msra.gmra.mrb[0].mxu0 %v135_v10  ;;  %2009 = vmatmul.mubr.f32.vlgmr.msra.gmra.mrb[0].mxu1 %v587_v12 }
  0x64   :  { %1982 = vmatpush3.xpose.msra.mxu0 %v70_v8  ;;  %2012 = vmatpush3.xpose.msra.mxu1 %v522_v9 }
  0x65   :  { %1983 = vmatprep.mubr.msk.f32.mxu0 %vm2232_vm0, %v2231_v0  ;;  %2013 = vmatprep.mubr.msk.f32.mxu1 %vm2232_vm0, %v2231_v0 }
  0x66   :  { %2016 = vmatprep.subr.mxu0 %v2231_v0  ;;  %2046 = vmatprep.subr.mxu1 %v2231_v0 }
  0x6b   :  { %1984 = vmatmul.mubr.f32.vlgmr.msra.gmra.mrb[0].mxu0 %v135_v10  ;;  %2014 = vmatmul.mubr.f32.vlgmr.msra.gmra.mrb[0].mxu1 %v587_v12  ;;  %v1523_v10 = vand.u32 4294901760, %v1522_v6 }
  0x6c   :  { %2018 = vmatprep.mubr.msk.f32.mxu0 %vm2232_vm0, %v2231_v0  ;;  %2048 = vmatprep.mubr.msk.f32.mxu1 %vm2232_vm0, %v2231_v0 }
  0x6d   :  { %2017 = vmatpush3.msra.mxu0 %v2356_v46  ;;  %2047 = vmatpush3.msra.mxu1 %v2360_v48 }
  0x6e   :  { %2021 = vmatprep.subr.mxu0 %v2231_v0  ;;  %2051 = vmatprep.subr.mxu1 %v2231_v0 }
 0x13e   :  { %v511_v29 = vpop.f32.mrb[0].mxu0  ;;  %v963_v30 = vpop.f32.mrb[0].mxu1 }
 0x13f   :  { %v1985_v31 = vpop.f32.mrb[1].mxu0  ;;  %v968_v32 = vsel %vm967_vm2, %v511_v29, -inf  ;;  %v2015_v33 = vpop.f32.mrb[1].mxu1  ;;  %v971_v34 = vsel %vm967_vm2, %v963_v30, -inf }
 0x140   :  { %969 = vmax.xlane.f32.xlu0 %v968_v32 }
 0x144   :  { %972 = vmax.xlane.f32.xlu0 %v971_v34 }
 0x1cd   :  { %v970_v35 = vpop.xlane.xlu0 %969 }
 0x1ce   :  { %v974_v36 = vsub.f32 %v511_v29, %v970_v35 }
 0x1d0   :  { %v976_v37 = vmul.f32 1.442695, %v974_v36 }
 0x1d1   :  { %v973_v38 = vpop.xlane.xlu0 %972 }
 0x1d2   :  { %2124 = vpow2.f32 %v976_v37  ;;  %v975_v39 = vsub.f32 %v963_v30, %v973_v38 }
 0x1d4   :  { %v978_v40 = vmul.f32 1.442695, %v975_v39 }
 0x1d6   :  { %2126 = vpow2.f32 %v978_v40 }
 0x1dc   :  { %v2125_v41 = vpop.eup %2124 }
 0x1dd   :  { %v980_v42 = vsel %vm967_vm2, %v2125_v41, 0.0 }
 0x1de   :  { %981 = vadd.xlane.f32.xlu1 %v980_v42 }
 0x1e0   :  { %v2127_v43 = vpop.eup %2126 }
 0x1e1   :  { %v983_v44 = vsel %vm967_vm2, %v2127_v43, 0.0 }
 0x1e2   :  { %984 = vadd.xlane.f32.xlu1 %v983_v44 }
 0x26b   :  { %v982_v49 = vpop.xlane.xlu1 %981 }
 0x26c   :  { %2128 = vrcp.f32 %v982_v49 }
 0x26f   :  { %v985_v50 = vpop.xlane.xlu1 %984 }
 0x270   :  { %2130 = vrcp.f32 %v985_v50 }
 0x276   :  { %v2129_v52 = vpop.eup %2128 }
 0x277   :  { %v987_v53 = vmul.f32 %v2129_v52, %v2125_v41 }
 0x279   :  { %v991_v54 = vsel %vm967_vm2, %v987_v53, 0 }
 0x27a   :  { %v2131_v57 = vpop.eup %2130  ;;  %v1059_v58 = vand.u32 4294901760, %v991_v54 }
 0x27b   :  { %v989_v59 = vmul.f32 %v2131_v57, %v2127_v43 }
 0x27c   :  { %v1060_v60 = vsub.f32 %v991_v54, %v1059_v58 }
 0x27d   :  { %v1440_v61 = vsel %vm967_vm2, %v989_v59, 0 }
 0x27e   :  { %v1508_v1 = vand.u32 4294901760, %v1440_v61  ;;  %v1061_v2 = vand.u32 4294901760, %v1060_v60 }
 0x280   :  { %v1062_v3 = vsub.f32 %v1060_v60, %v1061_v2  ;;  %v1509_v4 = vsub.f32 %v1440_v61, %v1508_v1 }
 0x282   :  { %v1063_v7 = vand.u32 4294901760, %v1062_v3  ;;  %v1510_v8 = vand.u32 4294901760, %v1509_v4 }
 0x284   :  { %2019 = vmatmul.mubr.f32.vlgmr.msra.gmra.mrb[2].mxu0 %v1063_v7  ;;  %v1511_v9 = vsub.f32 %v1509_v4, %v1510_v8 }
 0x285   :  { %2022 = vmatpush3.msra.mxu0 %v1074_v5  ;;  %2023 = vmatprep.mubr.msk.f32.mxu0 %vm2232_vm0, %v2231_v0 }
 0x286   :  { %v1512_v11 = vand.u32 4294901760, %v1511_v9  ;;  %2026 = vmatprep.subr.mxu0 %v2231_v0 }
 0x288   :  { %2049 = vmatmul.mubr.f32.vlgmr.msra.gmra.mrb[2].mxu1 %v1512_v11 }
 0x289   :  { %2052 = vmatpush3.msra.mxu1 %v1523_v10  ;;  %2053 = vmatprep.mubr.msk.f32.mxu1 %vm2232_vm0, %v2231_v0 }
 0x28a   :  { %2056 = vmatprep.subr.mxu1 %v2231_v0 }
 0x28c   :  { %2024 = vmatmul.mubr.f32.vlgmr.msra.gmra.mrb[2].mxu0 %v1059_v58 }
 0x28d   :  { %2027 = vmatpush3.msra.mxu0 %v1071_v51  ;;  %2028 = vmatprep.mubr.msk.f32.mxu0 %vm2232_vm0, %v2231_v0 }
 0x28e   :  { %2031 = vmatprep.subr.mxu0 %v2231_v0 }
 0x290   :  { %2054 = vmatmul.mubr.f32.vlgmr.msra.gmra.mrb[2].mxu1 %v1508_v1 }
 0x291   :  { %2057 = vmatpush3.msra.mxu1 %v1520_v55  ;;  %2058 = vmatprep.mubr.msk.f32.mxu1 %vm2232_vm0, %v2231_v0 }
 0x292   :  { %2061 = vmatprep.subr.mxu1 %v2231_v0 }
 0x294   :  { %2029 = vmatmul.mubr.f32.vlgmr.msra.gmra.mrb[2].mxu0 %v1060_v60 }
 0x295   :  { %2032 = vmatpush3.msra.mxu0 %v2356_v46  ;;  %2033 = vmatprep.mubr.msk.f32.mxu0 %vm2232_vm0, %v2231_v0 }
 0x296   :  { %2036 = vmatprep.subr.mxu0 %v2231_v0 }
 0x298   :  { %2059 = vmatmul.mubr.f32.vlgmr.msra.gmra.mrb[2].mxu1 %v1509_v4 }
 0x299   :  { %2062 = vmatpush3.msra.mxu1 %v2360_v48  ;;  %2063 = vmatprep.mubr.msk.f32.mxu1 %vm2232_vm0, %v2231_v0 }
 0x29a   :  { %2066 = vmatprep.subr.mxu1 %v2231_v0 }
 0x29c   :  { %2034 = vmatmul.mubr.f32.vlgmr.msra.gmra.mrb[2].mxu0 %v1061_v2 }
 0x29d   :  { %2037 = vmatpush3.msra.mxu0 %v1072_v56  ;;  %2038 = vmatprep.mubr.msk.f32.mxu0 %vm2232_vm0, %v2231_v0 }
 0x29e   :  { %2041 = vmatprep.subr.mxu0 %v2231_v0 }
 0x2a0   :  { %2064 = vmatmul.mubr.f32.vlgmr.msra.gmra.mrb[2].mxu1 %v1510_v8 }
 0x2a1   :  { %2067 = vmatpush3.msra.mxu1 %v1521_v63  ;;  %2068 = vmatprep.mubr.msk.f32.mxu1 %vm2232_vm0, %v2231_v0 }
 0x2a2   :  { %2071 = vmatprep.subr.mxu1 %v2231_v0 }
 0x2a4   :  { %2039 = vmatmul.mubr.f32.vlgmr.msra.gmra.mrb[2].mxu0 %v1059_v58 }
 0x2a5   :  { %2042 = vmatpush3.msra.mxu0 %v2356_v46  ;;  %2043 = vmatprep.mubr.msk.f32.mxu0 %vm2232_vm0, %v2231_v0 }
 0x2a8   :  { %2069 = vmatmul.mubr.f32.vlgmr.msra.gmra.mrb[2].mxu1 %v1508_v1 }
 0x2a9   :  { %2072 = vmatpush3.msra.mxu1 %v2360_v48  ;;  %2073 = vmatprep.mubr.msk.f32.mxu1 %vm2232_vm0, %v2231_v0 }
 0x2ac   :  { %2044 = vmatmul.mubr.f32.vlgmr.msra.gmra.mrb[2].mxu0 %v1059_v58 }
 0x2b0   :  { %2074 = vmatmul.mubr.f32.vlgmr.msra.gmra.mrb[2].mxu1 %v1508_v1 }
 0x37f   :  { %v1435_v12 = vpop.f32.mrb[2].mxu0 }
 0x380   :  { %1888 = vst.msk [vmem:[#allocation8] sm:$0xff] %vm62_vm1, %v1435_v12  ;;  %v2045_v13 = vpop.f32.mrb[3].mxu0 }
 0x383   :  { %v1884_v14 = vpop.f32.mrb[2].mxu1 }
 0x384   :  { %1889 = vst.msk [vmem:[#allocation8 + $0x8] sm:$0xff] %vm62_vm1, %v1884_v14  ;;  %v2075_v15 = vpop.f32.mrb[3].mxu1 }
 0x385   :  { %2209 = shalt.err (!%p2206_p0)
}
 0x386   :  { %s2210_s27 = scalar_lea.hbm %s2420_s3, 256 }
 0x387   :  { %p2211_p1 = scmp.ne.s32.totalorder %s2420_s3, %s2210_s27  ;;  %p2214_p2 = scmp.lt.u32.totalorder %s2210_s27, %s2420_s3 }
 0x389   :  { %p2216_p3 = pnand %p2214_p2, %p2211_p1 }
 0x38b   :  { %2219 = shalt.err (!%p2216_p3)
}
 0x38c   :  { %1901 = dma.vmem_to_hbm [thread:$0]  %s1896_s21, 256, %s2420_s3, [#allocation4], %s2228_s24, %s2228_s24, %s2229_s25  }
 0x38d   :  { %2224 = dma.done.wait [#allocation4], 256  }
 0x38e   :  { %2225 = vsyncadd [#allocation4], 4294967040 }
 0x38f   :  { %1905 = vsyncpa [#allocation3], 1 }
 0x390   :  { %1906 = vsyncpa [#allocation6], 1 }
 0x391   :  { %1907 = vsyncpa [#allocation4], 1 }

</bundles_post_ra>
